<compile_context>
chip_gen: v6e
topology: v6e:2x2x1
jax: 0.10.0
libtpu: 0.0.40
codegen_flags: <defaults>
</compile_context>

<pallas_src>
import functools
import math

import jax
import jax.numpy as jnp
from jax.experimental import pallas as pl
from jax.experimental.pallas import tpu as pltpu

LANE = 128
_MIB = 1024 * 1024


def _round_up(x, m):
    return ((x + m - 1) // m) * m


def _pad2(arr, rows, cols):
    pr, pc = rows - arr.shape[0], cols - arr.shape[1]
    if pr or pc:
        arr = jnp.pad(arr, ((0, pr), (0, pc)))
    return arr


def _vmem_budget_bytes():
    """Generation-aware VMEM budget: ~75% of physical capacity.

    Falls back to the smallest physical size (v7x: 64 MiB) if the query is
    unavailable, so the result is always safe on v5e/v6e/v7x.
    """
    cap = 64 * _MIB
    try:
        info = pltpu.get_tpu_info()
        cap = int(getattr(info, "vmem_capacity_bytes", cap)) or cap
    except Exception:  # pragma: no cover - conservative fallback
        pass
    cap = max(64 * _MIB, min(cap, 128 * _MIB))
    return int(cap * 0.75)


def _largest_div_tile(n_pad, max_tile):
    """Largest multiple of 128 <= max_tile that divides n_pad (n_pad % 128 == 0)."""
    t = min(max_tile, n_pad)
    t = max(LANE, (t // LANE) * LANE)
    while n_pad % t:
        t -= LANE
    return t


# ----------------------------------------------------------------------------
# Path 1: fully fused forward — Ahat / X / W resident in VMEM across all layers
# ----------------------------------------------------------------------------
def _fused_kernel(a_ref, x_ref, w_ref, o_ref, *, num_layers):
    a = a_ref[...]                               # bf16 (n_pad, n_pad), VMEM-resident
    x = x_ref[...].astype(jnp.bfloat16)          # bf16 (n_pad, f_pad)
    for layer in range(num_layers):              # static unroll over layers
        w = w_ref[layer]                         # bf16 (f_pad, f_pad)
        xw = jnp.dot(x, w, preferred_element_type=jnp.float32).astype(jnp.bfloat16)
        h = jnp.maximum(jnp.dot(a, xw, preferred_element_type=jnp.float32), 0.0)
        if layer + 1 < num_layers:
            x = h.astype(jnp.bfloat16)           # intermediate layers stay bf16
        else:
            o_ref[...] = h.astype(o_ref.dtype)   # final layer stored in f32


def _fused_forward(a_bf16, x_bf16, w_stack_bf16, vmem_limit):
    n_pad = a_bf16.shape[0]
    num_layers, f_pad, _ = w_stack_bf16.shape
    kernel = functools.partial(_fused_kernel, num_layers=num_layers)
    return pl.pallas_call(
        kernel,
        out_shape=jax.ShapeDtypeStruct((n_pad, f_pad), jnp.float32),
        grid=(1,),
        in_specs=[
            pl.BlockSpec((n_pad, n_pad), lambda i: (0, 0)),
            pl.BlockSpec((n_pad, f_pad), lambda i: (0, 0)),
            pl.BlockSpec((num_layers, f_pad, f_pad), lambda i: (0, 0, 0)),
        ],
        out_specs=pl.BlockSpec((n_pad, f_pad), lambda i: (0, 0)),
        compiler_params=pltpu.CompilerParams(
            dimension_semantics=("arbitrary",),
            vmem_limit_bytes=vmem_limit,
        ),
    )(a_bf16, x_bf16, w_stack_bf16)


# ----------------------------------------------------------------------------
# Path 2a: feature transform  XW = X @ W   (row-tiled, bf16 MXU, f32 acc)
# ----------------------------------------------------------------------------
def _xw_kernel(x_ref, w_ref, o_ref):
    o_ref[...] = jnp.dot(
        x_ref[...].astype(jnp.bfloat16),
        w_ref[...],
        preferred_element_type=jnp.float32,
    ).astype(o_ref.dtype)


def _feature_transform(x_pad, w_bf16, tx, vmem_limit):
    n_pad, f_in = x_pad.shape
    f_out = w_bf16.shape[1]
    return pl.pallas_call(
        _xw_kernel,
        out_shape=jax.ShapeDtypeStruct((n_pad, f_out), jnp.bfloat16),
        grid=(n_pad // tx,),
        in_specs=[
            pl.BlockSpec((tx, f_in), lambda i: (i, 0)),
            pl.BlockSpec((f_in, f_out), lambda i: (0, 0)),  # W fetched once, resident
        ],
        out_specs=pl.BlockSpec((tx, f_out), lambda i: (i, 0)),
        compiler_params=pltpu.CompilerParams(
            dimension_semantics=("parallel",),
            vmem_limit_bytes=vmem_limit,
        ),
    )(x_pad, w_bf16)


# ----------------------------------------------------------------------------
# Path 2b: aggregation  OUT = ReLU(Ahat @ XW)
# ----------------------------------------------------------------------------
def _accumulate_and_finalize(part, o_ref, acc_ref):
    k = pl.program_id(1)

    @pl.when(k == 0)
    def _():
        acc_ref[...] = part            # init with first partial (no zero-fill pass)

    @pl.when(k > 0)
    def _():
        acc_ref[...] += part

    @pl.when(k == pl.num_programs(1) - 1)
    def _():
        o_ref[...] = jnp.maximum(acc_ref[...], 0.0).astype(o_ref.dtype)


def _agg_resident_kernel(a_ref, xw_ref, o_ref, acc_ref, *, tk):
    # xw_ref holds the WHOLE XW matrix (fetched once, VMEM-resident); slice the
    # current k block in-kernel.
    k = pl.program_id(1)
    start = pl.multiple_of(k * tk, tk)
    xw_blk = xw_ref[pl.ds(start, tk), :]
    part = jnp.dot(a_ref[...], xw_blk, preferred_element_type=jnp.float32)
    _accumulate_and_finalize(part, o_ref, acc_ref)


def _agg_streamed_kernel(a_ref, xw_ref, o_ref, acc_ref):
    part = jnp.dot(a_ref[...], xw_ref[...], preferred_element_type=jnp.float32)
    _accumulate_and_finalize(part, o_ref, acc_ref)


def _aggregate(a_bf16, xw_bf16, tm, tk, out_dtype, vmem_limit, budget):
    n_pad = a_bf16.shape[0]
    f_out = xw_bf16.shape[1]

    # Keep XW fully VMEM-resident when it fits (removes the per-row-tile
    # re-streaming of XW, ~f_out/tm extra HBM traffic otherwise).
    resident_bytes = (
        2 * n_pad * f_out * 2      # XW (assume double-buffered, bf16)
        + 2 * tm * tk * 2          # A blocks, double-buffered, bf16
        + 2 * tm * f_out * 4       # output blocks
        + tm * f_out * 4           # f32 accumulator scratch
    )
    if resident_bytes <= int(budget * 0.8):
        kernel = functools.partial(_agg_resident_kernel, tk=tk)
        xw_spec = pl.BlockSpec((n_pad, f_out), lambda i, k: (0, 0))
    else:
        kernel = _agg_streamed_kernel
        xw_spec = pl.BlockSpec((tk, f_out), lambda i, k: (k, 0))

    return pl.pallas_call(
        kernel,
        out_shape=jax.ShapeDtypeStruct((n_pad, f_out), out_dtype),
        grid=(n_pad // tm, n_pad // tk),
        in_specs=[pl.BlockSpec((tm, tk), lambda i, k: (i, k)), xw_spec],
        out_specs=pl.BlockSpec((tm, f_out), lambda i, k: (i, 0)),
        scratch_shapes=[pltpu.VMEM((tm, f_out), jnp.float32)],
        compiler_params=pltpu.CompilerParams(
            dimension_semantics=("parallel", "arbitrary"),
            vmem_limit_bytes=vmem_limit,
        ),
    )(a_bf16, xw_bf16)


# ----------------------------------------------------------------------------
# Forward pass (mirrors Sp_GCN.forward; activation fixed to ReLU)
# ----------------------------------------------------------------------------
def sp_gcn_forward(A_list, Nodes_list, nodes_mask_list, w_list,
                   tm_max=512, tk_max=2048, force_tiled=False):
    del nodes_mask_list  # unused in Sp_GCN.forward, kept for signature parity
    ahat = A_list[-1]
    x = Nodes_list[-1]
    n = ahat.shape[0]
    num_layers = len(w_list)
    f_out_final = w_list[-1].shape[1]

    budget = _vmem_budget_bytes()
    vmem_limit = budget

    # --- fused path: Ahat resident across all layers -------------------------
    n_pad_f = _round_up(n, LANE)
    f_dims = [x.shape[1]] + [w.shape[0] for w in w_list] + [w.shape[1] for w in w_list]
    f_pad = max(_round_up(d, LANE) for d in f_dims)
    fused_bytes = (
        2 * n_pad_f * n_pad_f * 2            # Ahat bf16 (assume 2 buffers)
        + 12 * n_pad_f * f_pad               # x / xw / h working set
        + 4 * n_pad_f * f_pad                # f32 output
        + 2 * num_layers * f_pad * f_pad     # stacked bf16 weights
    )
    if not force_tiled and fused_bytes <= int(budget * 0.6):
        a_p = _pad2(ahat, n_pad_f, n_pad_f).astype(jnp.bfloat16)
        x_p = _pad2(x, n_pad_f, f_pad).astype(jnp.bfloat16)
        w_stack = jnp.stack(
            [_pad2(w, f_pad, f_pad) for w in w_list]
        ).astype(jnp.bfloat16)
        out = _fused_forward(a_p, x_p, w_stack, vmem_limit)
        return out[:n, :f_out_final]

    # --- tiled path: per-layer XW kernel + (tm, tk) aggregation --------------
    tm = min(tm_max, _round_up(n, LANE))
    n_pad = _round_up(n, tm)                 # pad n to a multiple of the row tile
    if n_pad // tm < 2 and n_pad >= 2 * LANE:
        # keep >= 2 row tiles so the "parallel" axis can use both v7x TCs
        tm = _largest_div_tile(n_pad, n_pad // 2)
    tk = _largest_div_tile(n_pad, tk_max)
    tx = _largest_div_tile(n_pad, 2048)      # independent (larger) XW row tile

    a_pad = _pad2(ahat, n_pad, n_pad).astype(jnp.bfloat16)
    x_pad = _pad2(x, n_pad, _round_up(x.shape[1], LANE)).astype(jnp.bfloat16)

    for li, w in enumerate(w_list):
        fi, fo = w.shape
        w_pad = _pad2(w, _round_up(fi, LANE), _round_up(fo, LANE)).astype(jnp.bfloat16)
        xw = _feature_transform(x_pad, w_pad, tx, vmem_limit)       # bf16
        out_dtype = jnp.float32 if li == num_layers - 1 else jnp.bfloat16
        x_pad = _aggregate(a_pad, xw, tm, tk, out_dtype, vmem_limit, budget)

    return x_pad[:n, :f_out_final]


def _reset_param(key, shape):
    # mimics u.reset_param: uniform(-stdv, stdv) with stdv = 1/sqrt(fan_out)
    stdv = 1.0 / math.sqrt(shape[1])
    return jax.random.uniform(key, shape, jnp.float32, minval=-stdv, maxval=stdv)


def _bf16_reference(a, x0, ws):
    """Reference matching the kernel's bf16-input / f32-accumulate dtype path."""
    a_bf = a.astype(jnp.bfloat16)
    h = x0
    for w in ws:
        xw = jnp.dot(
            h.astype(jnp.bfloat16), w.astype(jnp.bfloat16),
            preferred_element_type=jnp.float32,
        ).astype(jnp.bfloat16)
        h = jnp.maximum(jnp.dot(a_bf, xw, preferred_element_type=jnp.float32), 0.0)
    return h


if __name__ == "__main__":
    # small, forward-consistent shapes
    num_nodes = 64
    feats_per_node = 32
    layer_1_feats = 32
    layer_2_feats = 32
    num_layers = 2

    key = jax.random.PRNGKey(0)
    k_a, k_x, k_w0, k_w1 = jax.random.split(key, 4)

    # deterministic synthetic row-normalized adjacency ("Ahat") and features
    ahat = jax.random.uniform(k_a, (num_nodes, num_nodes), jnp.float32)
    ahat = ahat / jnp.sum(ahat, axis=1, keepdims=True)
    node_feats = jax.random.normal(k_x, (num_nodes, feats_per_node), jnp.float32)

    w_list = [
        _reset_param(k_w0, (feats_per_node, layer_1_feats)),
        _reset_param(k_w1, (layer_1_feats, layer_2_feats)),
    ][:num_layers]

    A_list = [ahat]
    Nodes_list = [node_feats]
    nodes_mask_list = [None]  # unused in forward, kept for signature parity

    # ---- Path 1: fused (auto-selected at this size) --------------------------
    out = jax.block_until_ready(
        sp_gcn_forward(A_list, Nodes_list, nodes_mask_list, w_list))
    assert out.shape == (num_nodes, layer_2_feats)

    ref_bf = _bf16_reference(ahat, node_feats, w_list)
    assert jnp.allclose(out, ref_bf, atol=2e-3, rtol=2e-3), "fused: bf16 ref mismatch"

    ref_f32 = node_feats
    for w in w_list:
        ref_f32 = jnp.maximum(ahat @ (ref_f32 @ w), 0.0)
    assert jnp.allclose(out, ref_f32, atol=5e-2, rtol=5e-2), "fused: f32 ref mismatch"

    # ---- Path 2: tiled fallback, forced, awkward N to cover padding + grids ---
    n2 = 300
    k_a2, k_x2 = jax.random.split(jax.random.PRNGKey(0), 2)
    ahat2 = jax.random.uniform(k_a2, (n2, n2), jnp.float32)
    ahat2 = ahat2 / jnp.sum(ahat2, axis=1, keepdims=True)
    x2 = jax.random.normal(k_x2, (n2, feats_per_node), jnp.float32)

    out2 = jax.block_until_ready(
        sp_gcn_forward([ahat2], [x2], [None], w_list,
                       tk_max=128, force_tiled=True))  # small tk -> multi-k grid
    assert out2.shape == (n2, layer_2_feats)
    ref2 = _bf16_reference(ahat2, x2, w_list)
    assert jnp.allclose(out2, ref2, atol=2e-3, rtol=2e-3), "tiled: bf16 ref mismatch"

    print("KERNEL_OK")
</pallas_src>

<mosaic_0001>
module attributes {stable_mosaic.version = 11 : i64} {
  func.func @_fused_kernel(%arg0: i32, %arg1: memref<128x128xbf16, #tpu.memory_space<vmem>>, %arg2: memref<128x128xbf16, #tpu.memory_space<vmem>>, %arg3: memref<2x128x128xbf16, #tpu.memory_space<vmem>>, %arg4: memref<128x128xf32, #tpu.memory_space<vmem>>) attributes {dimension_semantics = [#tpu.dimension_semantics<arbitrary>], iteration_bounds = array<i64: 1>, scalar_prefetch = 0 : i64, scratch_operands = 0 : i64, tpu.core_type = #tpu.core_type<tc>, window_params = [{pipeline_mode = #tpu.pipeline_mode<synchronous>, transform_indices = @transform_0, window_bounds = array<i64: 128, 128>}, {pipeline_mode = #tpu.pipeline_mode<synchronous>, transform_indices = @transform_1, window_bounds = array<i64: 128, 128>}, {pipeline_mode = #tpu.pipeline_mode<synchronous>, transform_indices = @transform_2, window_bounds = array<i64: 2, 128, 128>}, {pipeline_mode = #tpu.pipeline_mode<synchronous>, transform_indices = @transform_3, window_bounds = array<i64: 128, 128>}]} {
    %c0 = arith.constant 0 : index
    %c0_0 = arith.constant 0 : index
    %0 = vector.load %arg1[%c0, %c0_0] : memref<128x128xbf16, #tpu.memory_space<vmem>>, vector<128x128xbf16>
    %c0_1 = arith.constant 0 : index
    %c0_2 = arith.constant 0 : index
    %1 = vector.load %arg2[%c0_1, %c0_2] : memref<128x128xbf16, #tpu.memory_space<vmem>>, vector<128x128xbf16>
    %c0_3 = arith.constant 0 : index
    %c0_4 = arith.constant 0 : index
    %c0_5 = arith.constant 0 : index
    %2 = vector.load %arg3[%c0_3, %c0_4, %c0_5] : memref<2x128x128xbf16, #tpu.memory_space<vmem>>, vector<1x128x128xbf16>
    %3 = vector.shape_cast %2 : vector<1x128x128xbf16> to vector<128x128xbf16>
    %cst = arith.constant dense<0.000000e+00> : vector<128x128xf32>
    %4 = tpu.matmul %1, %3, %cst {dimension_numbers = #tpu.dot_dimension_numbers<[1], [0], [0], [1], [0, 0, 1, 1], [], []>} : vector<128x128xbf16>, vector<128x128xbf16>, vector<128x128xf32> -> vector<128x128xf32>
    %5 = arith.truncf %4 : vector<128x128xf32> to vector<128x128xbf16>
    %cst_6 = arith.constant dense<0.000000e+00> : vector<128x128xf32>
    %6 = tpu.matmul %0, %5, %cst_6 {dimension_numbers = #tpu.dot_dimension_numbers<[1], [0], [0], [1], [0, 0, 1, 1], [], []>} : vector<128x128xbf16>, vector<128x128xbf16>, vector<128x128xf32> -> vector<128x128xf32>
    %cst_7 = arith.constant 0.000000e+00 : f32
    %7 = vector.broadcast %cst_7 : f32 to vector<128x128xf32>
    %8 = arith.maximumf %6, %7 : vector<128x128xf32>
    %9 = arith.truncf %8 : vector<128x128xf32> to vector<128x128xbf16>
    %c1 = arith.constant 1 : index
    %c0_8 = arith.constant 0 : index
    %c0_9 = arith.constant 0 : index
    %10 = vector.load %arg3[%c1, %c0_8, %c0_9] : memref<2x128x128xbf16, #tpu.memory_space<vmem>>, vector<1x128x128xbf16>
    %11 = vector.shape_cast %10 : vector<1x128x128xbf16> to vector<128x128xbf16>
    %cst_10 = arith.constant dense<0.000000e+00> : vector<128x128xf32>
    %12 = tpu.matmul %9, %11, %cst_10 {dimension_numbers = #tpu.dot_dimension_numbers<[1], [0], [0], [1], [0, 0, 1, 1], [], []>} : vector<128x128xbf16>, vector<128x128xbf16>, vector<128x128xf32> -> vector<128x128xf32>
    %13 = arith.truncf %12 : vector<128x128xf32> to vector<128x128xbf16>
    %cst_11 = arith.constant dense<0.000000e+00> : vector<128x128xf32>
    %14 = tpu.matmul %0, %13, %cst_11 {dimension_numbers = #tpu.dot_dimension_numbers<[1], [0], [0], [1], [0, 0, 1, 1], [], []>} : vector<128x128xbf16>, vector<128x128xbf16>, vector<128x128xf32> -> vector<128x128xf32>
    %cst_12 = arith.constant 0.000000e+00 : f32
    %15 = vector.broadcast %cst_12 : f32 to vector<128x128xf32>
    %16 = arith.maximumf %14, %15 : vector<128x128xf32>
    %c0_13 = arith.constant 0 : index
    %c0_14 = arith.constant 0 : index
    %17 = vector.load %arg4[%c0_13, %c0_14] : memref<128x128xf32, #tpu.memory_space<vmem>>, vector<128x128xf32>
    tpu.vector_store %arg4[%c0_13, %c0_14], %16 {strides = array<i32>} : memref<128x128xf32, #tpu.memory_space<vmem>>, vector<128x128xf32>,
    return
  }
  func.func @transform_0(%arg0: i32) -> (i32, i32) {
    %c0_i32 = arith.constant 0 : i32
    %c0_i32_0 = arith.constant 0 : i32
    %c0_i32_1 = arith.constant 0 : i32
    return %c0_i32, %c0_i32_0 : i32, i32
  }
  func.func @transform_1(%arg0: i32) -> (i32, i32) {
    %c0_i32 = arith.constant 0 : i32
    %c0_i32_0 = arith.constant 0 : i32
    %c0_i32_1 = arith.constant 0 : i32
    return %c0_i32, %c0_i32_0 : i32, i32
  }
  func.func @transform_2(%arg0: i32) -> (i32, i32, i32) {
    %c0_i32 = arith.constant 0 : i32
    %c0_i32_0 = arith.constant 0 : i32
    %c0_i32_1 = arith.constant 0 : i32
    %c0_i32_2 = arith.constant 0 : i32
    return %c0_i32, %c0_i32_0, %c0_i32_1 : i32, i32, i32
  }
  func.func @transform_3(%arg0: i32) -> (i32, i32) {
    %c0_i32 = arith.constant 0 : i32
    %c0_i32_0 = arith.constant 0 : i32
    %c0_i32_1 = arith.constant 0 : i32
    return %c0_i32, %c0_i32_0 : i32, i32
  }
}

</mosaic_0001>

<bundles_post_ra>
// kernel: tpu_custom_call.1
= control target key start
LH: loop header
LB: loop body
LE: loop exit
PB: predicated region body
PF: predicated region fallthrough
CT: control target
= control target key end

     0   :  { %8 = vsyncpa [#allocation3], 0  ;;  %s1214_s0 = inlined_call_operand.hbm [shape: bf16[128,128], index: 0, kind: input, shape index: {}]   ;;  %s1215_s1 = inlined_call_operand.hbm [shape: bf16[128,128], index: 1, kind: input, shape index: {}]   ;;  %s1216_s2 = inlined_call_operand.hbm [shape: bf16[2,128,128], index: 2, kind: input, shape index: {}]   ;;  %s1217_s3 = inlined_call_operand.hbm [shape: f32[128,128], index: 3, kind: output, shape index: {}]  }
   0x1   :  { %9 = vsyncpa [#allocation6], 0 }
   0x2   :  { %10 = vsyncpa [#allocation4], 0  ;;  %s1142_s12 = smov [#allocation5]   ;;  %s1143_s14 = smov [#allocation2]  }
   0x3   :  { %s28_s13 = sshll.u32 %s1142_s12, 4  ;;  %s16_s15 = sshll.u32 %s1143_s14, 4  ;;  %s29_s13 = int_to_ptr.vmem [resolvable:$true] %s28_s13  ;;  %s17_s15 = int_to_ptr.vmem [resolvable:$true] %s16_s15 }
   0x4   :  { %s1064_s16 = scalar_lea.vmem %s29_s13, 1024  ;;  %p1069_p1 = scmp.lt.s32.totalorder %s29_s13, %s29_s13 }
   0x5   :  { %p1065_p0 = scmp.ne.s32.totalorder %s29_s13, %s1064_s16  ;;  %p1070_p2 = scmp.lt.s32.totalorder %s1064_s16, %s1064_s16 }
   0x7   :  { %p1071_p3 = por %p1070_p2, %p1069_p1 }
   0x9   :  { %p1072_p4 = pnand %p1071_p3, %p1065_p0 }
   0xb   :  { %1075 = shalt.err (!%p1072_p4)
}
   0xc   :  { %s1144_s17 = smov 64   ;;  %s1145_s18 = smov 4  }
   0xd   :  { %34 = dma.hbm_to_vmem [thread:$0]  %s1215_s1, 1024, %s29_s13, [#allocation6], %s1144_s17, %s1144_s17, %s1145_s18  }
   0xe   :  { %s1084_s21 = scalar_lea.vmem %s17_s15, 1024  ;;  %p1089_p6 = scmp.lt.s32.totalorder %s17_s15, %s17_s15 }
   0xf   :  { %p1085_p5 = scmp.ne.s32.totalorder %s17_s15, %s1084_s21  ;;  %p1090_p7 = scmp.lt.s32.totalorder %s1084_s21, %s1084_s21 }
  0x11   :  { %p1091_p8 = por %p1090_p7, %p1089_p6 }
  0x13   :  { %p1092_p9 = pnand %p1091_p8, %p1085_p5 }
  0x15   :  { %1095 = shalt.err (!%p1092_p9)
}
  0x16   :  { %22 = dma.hbm_to_vmem [thread:$0]  %s1214_s0, 1024, %s17_s15, [#allocation3], %s1144_s17, %s1144_s17, %s1145_s18  }
  0x17   :  { %s1146_s24 = smov [#allocation7]  }
  0x18   :  { %s40_s25 = sshll.u32 %s1146_s24, 4  ;;  %s41_s25 = int_to_ptr.vmem [resolvable:$true] %s40_s25 }
  0x19   :  { %s1104_s26 = scalar_lea.vmem %s41_s25, 2048  ;;  %p1109_p11 = scmp.lt.s32.totalorder %s41_s25, %s41_s25 }
  0x1a   :  { %p1105_p10 = scmp.ne.s32.totalorder %s41_s25, %s1104_s26  ;;  %p1110_p12 = scmp.lt.s32.totalorder %s1104_s26, %s1104_s26 }
  0x1c   :  { %p1111_p13 = por %p1110_p12, %p1109_p11 }
  0x1e   :  { %p1112_p0 = pnand %p1111_p13, %p1105_p10 }
  0x20   :  { %1115 = shalt.err (!%p1112_p0)
}
  0x21   :  { %46 = dma.hbm_to_vmem [thread:$0]  %s1216_s2, 2048, %s41_s25, [#allocation6], %s1144_s17, %s1144_s17, %s1145_s18  }
  0x22   :  { %1136 = dma.done.wait [#allocation3], 1024  }
  0x23   :  { %1137 = vsyncadd [#allocation3], 4294966272 }
  0x24   :  { %1138 = dma.done.wait [#allocation6], 3072  }
  0x25   :  { %1139 = vsyncadd [#allocation6], 4294964224  ;;  %v1024_v0 = vld [vmem:[#allocation7 + $0x38] sm:$0xff]   ;;  %v1025_v1 = vld [vmem:[#allocation7 + $0x30] sm:$0xff]   ;;  %s1147_s0 = smov [#allocation8]  }
  0x26   :  { %888 = vmatprep.subr.bf16.mxu0 %v1024_v0  ;;  %v1026_v2 = vld [vmem:[#allocation7 + $0x28] sm:$0xff]   ;;  %v1027_v3 = vld [vmem:[#allocation7 + $0x20] sm:$0xff]   ;;  %v1028_v5 = vld [vmem:[#allocation7 + $0x18] sm:$0xff]   ;;  %s779_s2 = sshll.u32 %s1147_s0, 4  ;;  %s780_s2 = int_to_ptr.vmem [resolvable:$true] %s779_s2 }
  0x27   :  { %889 = vmatpush3.bf16.msra.mxu0 %v1024_v0  ;;  %v1032_v4 = vld [vmem:[#allocation5] sm:$0xff]   ;;  %v1029_v6 = vld [vmem:[#allocation7 + $0x10] sm:$0xff]   ;;  %v1030_v7 = vld [vmem:[#allocation7 + $0x8] sm:$0xff]   ;;  %s1116_s28 = scalar_lea.vmem %s780_s2, 2048  ;;  %p1121_p2 = scmp.lt.s32.totalorder %s780_s2, %s780_s2 }
  0x28   :  { %890 = vmatprep.subr.bf16.mxu0 %v1025_v1  ;;  %904 = vmatprep.mubr.bf16.mxu0 %v1032_v4  ;;  %v1031_v8 = vld [vmem:[#allocation7] sm:$0xff]   ;;  %v1033_v9 = vld [vmem:[#allocation5 + $0x8] sm:$0xff]   ;;  %v1034_v10 = vld [vmem:[#allocation5 + $0x10] sm:$0xff]   ;;  %p1117_p1 = scmp.ne.s32.totalorder %s780_s2, %s1116_s28  ;;  %p1122_p3 = scmp.lt.s32.totalorder %s1116_s28, %s1116_s28 }
  0x29   :  { %v1035_v11 = vld [vmem:[#allocation5 + $0x18] sm:$0xff]   ;;  %v1036_v12 = vld [vmem:[#allocation5 + $0x20] sm:$0xff]   ;;  %v1037_v13 = vld [vmem:[#allocation5 + $0x28] sm:$0xff]  }
  0x2a   :  { %v1038_v14 = vld [vmem:[#allocation5 + $0x30] sm:$0xff]   ;;  %v1039_v15 = vld [vmem:[#allocation5 + $0x38] sm:$0xff]   ;;  %v1179_v16 = vld [vmem:[#allocation2] sm:$0xff]   ;;  %p1123_p4 = por %p1122_p3, %p1121_p2 }
  0x2b   :  { %891 = vmatpush3.bf16.msra.mxu0 %v1025_v1  ;;  %936 = vmatprep.mubr.bf16.mxu1 %v1179_v16  ;;  %v1048_v17 = vld [vmem:[#allocation7 + $0x78] sm:$0xff]   ;;  %v1049_v18 = vld [vmem:[#allocation7 + $0x70] sm:$0xff]   ;;  %v1050_v19 = vld [vmem:[#allocation7 + $0x68] sm:$0xff]  }
  0x2c   :  { %892 = vmatprep.subr.bf16.mxu0 %v1026_v2  ;;  %v1051_v20 = vld [vmem:[#allocation7 + $0x60] sm:$0xff]   ;;  %v1052_v21 = vld [vmem:[#allocation7 + $0x58] sm:$0xff]   ;;  %v1182_v46 = vld [vmem:[#allocation2 + $0x8] sm:$0xff]   ;;  %p1124_p5 = pnand %p1123_p4, %p1117_p1 }
  0x2d   :  { %v1184_v47 = vld [vmem:[#allocation2 + $0x10] sm:$0xff]   ;;  %v1188_v48 = vld [vmem:[#allocation2 + $0x18] sm:$0xff]   ;;  %v1190_v49 = vld [vmem:[#allocation2 + $0x20] sm:$0xff]  }
  0x2e   :  { %v1194_v50 = vld [vmem:[#allocation2 + $0x28] sm:$0xff]   ;;  %v1196_v51 = vld [vmem:[#allocation2 + $0x30] sm:$0xff]   ;;  %v1200_v52 = vld [vmem:[#allocation2 + $0x38] sm:$0xff]  }
  0x2f   :  { %893 = vmatpush3.bf16.msra.mxu0 %v1026_v2  ;;  %v1053_v53 = vld [vmem:[#allocation7 + $0x50] sm:$0xff]   ;;  %v1054_v54 = vld [vmem:[#allocation7 + $0x48] sm:$0xff]   ;;  %v1055_v55 = vld [vmem:[#allocation7 + $0x40] sm:$0xff]  }
  0x30   :  { %894 = vmatprep.subr.bf16.mxu0 %v1027_v3 }
  0x33   :  { %895 = vmatpush3.bf16.msra.mxu0 %v1027_v3 }
  0x34   :  { %896 = vmatprep.subr.bf16.mxu0 %v1028_v5 }
  0x37   :  { %897 = vmatpush3.bf16.msra.mxu0 %v1028_v5 }
  0x38   :  { %898 = vmatprep.subr.bf16.mxu0 %v1029_v6 }
  0x3b   :  { %899 = vmatpush3.bf16.msra.mxu0 %v1029_v6 }
  0x3c   :  { %900 = vmatprep.subr.bf16.mxu0 %v1030_v7 }
  0x3f   :  { %901 = vmatpush3.bf16.msra.mxu0 %v1030_v7 }
  0x40   :  { %902 = vmatprep.subr.bf16.mxu0 %v1031_v8 }
  0x43   :  { %903 = vmatpush3.bf16.msra.mxu0 %v1031_v8 }
  0x44   :  { %952 = vmatprep.subr.bf16.mxu0 %v1048_v17 }
  0x46   :  { %905 = vmatmul.mubr.bf16.vlgmr.msra.gmra.mxu0 %v1033_v9 }
  0x47   :  { %908 = vmatprep.mubr.bf16.mxu0 %v1034_v10  ;;  %953 = vmatpush3.bf16.msra.mxu0 %v1048_v17 }
  0x48   :  { %954 = vmatprep.subr.bf16.mxu0 %v1049_v18 }
  0x4b   :  { %955 = vmatpush3.bf16.msra.mxu0 %v1049_v18 }
  0x4c   :  { %956 = vmatprep.subr.bf16.mxu0 %v1050_v19 }
  0x4e   :  { %909 = vmatmul.mubr.bf16.gmra.mxu0 %v1035_v11 }
  0x4f   :  { %912 = vmatprep.mubr.bf16.mxu0 %v1036_v12  ;;  %957 = vmatpush3.bf16.msra.mxu0 %v1050_v19 }
  0x50   :  { %958 = vmatprep.subr.bf16.mxu0 %v1051_v20 }
  0x53   :  { %959 = vmatpush3.bf16.msra.mxu0 %v1051_v20 }
  0x54   :  { %960 = vmatprep.subr.bf16.mxu0 %v1052_v21 }
  0x56   :  { %913 = vmatmul.mubr.bf16.gmra.mxu0 %v1037_v13 }
  0x57   :  { %916 = vmatprep.mubr.bf16.mxu0 %v1038_v14  ;;  %961 = vmatpush3.bf16.msra.mxu0 %v1052_v21 }
  0x58   :  { %962 = vmatprep.subr.bf16.mxu0 %v1053_v53 }
  0x5b   :  { %963 = vmatpush3.bf16.msra.mxu0 %v1053_v53 }
  0x5c   :  { %964 = vmatprep.subr.bf16.mxu0 %v1054_v54 }
  0x5e   :  { %917 = vmatmul.mubr.bf16.gmra.mxu0 %v1039_v15 }
  0x5f   :  { %965 = vmatpush3.bf16.msra.mxu0 %v1054_v54 }
  0x60   :  { %966 = vmatprep.subr.bf16.mxu0 %v1055_v55 }
  0x63   :  { %967 = vmatpush3.bf16.msra.mxu0 %v1055_v55 }
 0x106   :  { %v906_v22 = vpop.f32.mrf.mxu0 }
 0x108   :  { %v235_v23 = vpop.f32.mrf.mxu0 }
 0x10a   :  { %v907_v24 = vpop.f32.mrf.mxu0 }
 0x10b   :  { %v299_v44 = vpack.c.bf16 %v907_v24, %v906_v22 }
 0x10c   :  { %v238_v25 = vpop.f32.mrf.mxu0 }
 0x10d   :  { %v298_v45 = vpack.c.bf16 %v238_v25, %v235_v23 }
 0x10e   :  { %v910_v26 = vpop.f32.mrf.mxu0 }
 0x110   :  { %v251_v27 = vpop.f32.mrf.mxu0 }
 0x112   :  { %v911_v28 = vpop.f32.mrf.mxu0 }
 0x113   :  { %v301_v42 = vpack.c.bf16 %v911_v28, %v910_v26 }
 0x114   :  { %v254_v29 = vpop.f32.mrf.mxu0 }
 0x115   :  { %v300_v43 = vpack.c.bf16 %v254_v29, %v251_v27 }
 0x116   :  { %v914_v30 = vpop.f32.mrf.mxu0 }
 0x118   :  { %v267_v31 = vpop.f32.mrf.mxu0 }
 0x11a   :  { %v915_v32 = vpop.f32.mrf.mxu0 }
 0x11b   :  { %v303_v40 = vpack.c.bf16 %v915_v32, %v914_v30 }
 0x11c   :  { %v270_v33 = vpop.f32.mrf.mxu0 }
 0x11d   :  { %v302_v41 = vpack.c.bf16 %v270_v33, %v267_v31 }
 0x11e   :  { %v918_v34 = vpop.f32.mrf.mxu0 }
 0x120   :  { %v283_v35 = vpop.f32.mrf.mxu0 }
 0x122   :  { %v919_v36 = vpop.f32.mrf.mxu0 }
 0x123   :  { %v305_v37 = vpack.c.bf16 %v919_v36, %v918_v34 }
 0x124   :  { %v286_v38 = vpop.f32.mrf.mxu0 }
 0x125   :  { %v304_v39 = vpack.c.bf16 %v286_v38, %v283_v35  ;;  %920 = vmatprep.subr.bf16.mxu1 %v305_v37 }
 0x126   :  { %921 = vmatpush3.bf16.msra.mxu1 %v305_v37 }
 0x127   :  { %922 = vmatprep.subr.bf16.mxu1 %v304_v39 }
 0x12a   :  { %923 = vmatpush3.bf16.msra.mxu1 %v304_v39 }
 0x12b   :  { %924 = vmatprep.subr.bf16.mxu1 %v303_v40 }
 0x12e   :  { %925 = vmatpush3.bf16.msra.mxu1 %v303_v40 }
 0x12f   :  { %926 = vmatprep.subr.bf16.mxu1 %v302_v41 }
 0x132   :  { %927 = vmatpush3.bf16.msra.mxu1 %v302_v41 }
 0x133   :  { %928 = vmatprep.subr.bf16.mxu1 %v301_v42 }
 0x136   :  { %929 = vmatpush3.bf16.msra.mxu1 %v301_v42 }
 0x137   :  { %930 = vmatprep.subr.bf16.mxu1 %v300_v43 }
 0x13a   :  { %931 = vmatpush3.bf16.msra.mxu1 %v300_v43 }
 0x13b   :  { %932 = vmatprep.subr.bf16.mxu1 %v299_v44 }
 0x13e   :  { %933 = vmatpush3.bf16.msra.mxu1 %v299_v44 }
 0x13f   :  { %934 = vmatprep.subr.bf16.mxu1 %v298_v45 }
 0x142   :  { %935 = vmatpush3.bf16.msra.mxu1 %v298_v45 }
 0x145   :  { %937 = vmatmul.mubr.bf16.vlgmr.msra.gmra.mxu1 %v1182_v46 }
 0x146   :  { %940 = vmatprep.mubr.bf16.mxu1 %v1184_v47 }
 0x14d   :  { %941 = vmatmul.mubr.bf16.gmra.mxu1 %v1188_v48 }
 0x14e   :  { %944 = vmatprep.mubr.bf16.mxu1 %v1190_v49 }
 0x155   :  { %945 = vmatmul.mubr.bf16.gmra.mxu1 %v1194_v50 }
 0x156   :  { %948 = vmatprep.mubr.bf16.mxu1 %v1196_v51 }
 0x15d   :  { %949 = vmatmul.mubr.bf16.gmra.mxu1 %v1200_v52 }
 0x15e   :  { %1000 = vmatprep.mubr.bf16.mxu1 %v1179_v16 }
 0x205   :  { %v938_v56 = vpop.f32.mrf.mxu1 }
 0x206   :  { %v453_v63 = vmax.f32 %v938_v56, 0.0 }
 0x207   :  { %v388_v57 = vpop.f32.mrf.mxu1 }
 0x208   :  { %v451_v61 = vmax.f32 %v388_v57, 0.0 }
 0x209   :  { %v939_v58 = vpop.f32.mrf.mxu1 }
 0x20a   :  { %v454_v59 = vmax.f32 %v939_v58, 0.0 }
 0x20b   :  { %v391_v60 = vpop.f32.mrf.mxu1 }
 0x20c   :  { %v452_v62 = vmax.f32 %v391_v60, 0.0  ;;  %v468_v2 = vpack.c.bf16 %v454_v59, %v453_v63 }
 0x20d   :  { %v942_v0 = vpop.f32.mrf.mxu1 }
 0x20e   :  { %v467_v1 = vpack.c.bf16 %v452_v62, %v451_v61  ;;  %v457_v9 = vmax.f32 %v942_v0, 0.0 }
 0x20f   :  { %v404_v3 = vpop.f32.mrf.mxu1 }
 0x210   :  { %968 = vmatprep.mubr.bf16.mxu0 %v467_v1  ;;  %v455_v7 = vmax.f32 %v404_v3, 0.0 }
 0x211   :  { %v943_v4 = vpop.f32.mrf.mxu1  ;;  %969 = vmatmul.mubr.bf16.vlgmr.msra.gmra.mxu0 %v468_v2 }
 0x212   :  { %v458_v5 = vmax.f32 %v943_v4, 0.0 }
 0x213   :  { %v407_v6 = vpop.f32.mrf.mxu1 }
 0x214   :  { %v456_v8 = vmax.f32 %v407_v6, 0.0  ;;  %v470_v12 = vpack.c.bf16 %v458_v5, %v457_v9 }
 0x215   :  { %v946_v10 = vpop.f32.mrf.mxu1 }
 0x216   :  { %v469_v11 = vpack.c.bf16 %v456_v8, %v455_v7  ;;  %v461_v19 = vmax.f32 %v946_v10, 0.0 }
 0x217   :  { %v420_v13 = vpop.f32.mrf.mxu1 }
 0x218   :  { %972 = vmatprep.mubr.bf16.mxu0 %v469_v11  ;;  %v459_v17 = vmax.f32 %v420_v13, 0.0 }
 0x219   :  { %v947_v14 = vpop.f32.mrf.mxu1  ;;  %973 = vmatmul.mubr.bf16.gmra.mxu0 %v470_v12 }
 0x21a   :  { %v462_v15 = vmax.f32 %v947_v14, 0.0 }
 0x21b   :  { %v423_v16 = vpop.f32.mrf.mxu1 }
 0x21c   :  { %v460_v18 = vmax.f32 %v423_v16, 0.0  ;;  %v472_v22 = vpack.c.bf16 %v462_v15, %v461_v19 }
 0x21d   :  { %v950_v20 = vpop.f32.mrf.mxu1 }
 0x21e   :  { %v471_v21 = vpack.c.bf16 %v460_v18, %v459_v17  ;;  %v465_v29 = vmax.f32 %v950_v20, 0.0 }
 0x21f   :  { %v436_v23 = vpop.f32.mrf.mxu1 }
 0x220   :  { %976 = vmatprep.mubr.bf16.mxu0 %v471_v21  ;;  %v463_v27 = vmax.f32 %v436_v23, 0.0 }
 0x221   :  { %v951_v24 = vpop.f32.mrf.mxu1  ;;  %977 = vmatmul.mubr.bf16.gmra.mxu0 %v472_v22 }
 0x222   :  { %v466_v25 = vmax.f32 %v951_v24, 0.0 }
 0x223   :  { %v439_v26 = vpop.f32.mrf.mxu1 }
 0x224   :  { %v464_v28 = vmax.f32 %v439_v26, 0.0  ;;  %v474_v31 = vpack.c.bf16 %v466_v25, %v465_v29 }
 0x226   :  { %v473_v30 = vpack.c.bf16 %v464_v28, %v463_v27 }
 0x228   :  { %980 = vmatprep.mubr.bf16.mxu0 %v473_v30 }
 0x229   :  { %981 = vmatmul.mubr.bf16.gmra.mxu0 %v474_v31 }
 0x2d1   :  { %v970_v32 = vpop.f32.mrf.mxu0 }
 0x2d3   :  { %v574_v33 = vpop.f32.mrf.mxu0 }
 0x2d5   :  { %v971_v34 = vpop.f32.mrf.mxu0 }
 0x2d6   :  { %v638_v61 = vpack.c.bf16 %v971_v34, %v970_v32 }
 0x2d7   :  { %v577_v35 = vpop.f32.mrf.mxu0 }
 0x2d8   :  { %v637_v62 = vpack.c.bf16 %v577_v35, %v574_v33 }
 0x2d9   :  { %v974_v36 = vpop.f32.mrf.mxu0 }
 0x2db   :  { %v590_v37 = vpop.f32.mrf.mxu0 }
 0x2dd   :  { %v975_v38 = vpop.f32.mrf.mxu0 }
 0x2de   :  { %v640_v59 = vpack.c.bf16 %v975_v38, %v974_v36 }
 0x2df   :  { %v593_v39 = vpop.f32.mrf.mxu0 }
 0x2e0   :  { %v639_v60 = vpack.c.bf16 %v593_v39, %v590_v37 }
 0x2e1   :  { %v978_v40 = vpop.f32.mrf.mxu0 }
 0x2e3   :  { %v606_v41 = vpop.f32.mrf.mxu0 }
 0x2e5   :  { %v979_v42 = vpop.f32.mrf.mxu0 }
 0x2e6   :  { %v642_v57 = vpack.c.bf16 %v979_v42, %v978_v40 }
 0x2e7   :  { %v609_v43 = vpop.f32.mrf.mxu0 }
 0x2e8   :  { %v641_v58 = vpack.c.bf16 %v609_v43, %v606_v41 }
 0x2e9   :  { %v982_v44 = vpop.f32.mrf.mxu0 }
 0x2eb   :  { %v622_v45 = vpop.f32.mrf.mxu0 }
 0x2ed   :  { %v983_v53 = vpop.f32.mrf.mxu0 }
 0x2ee   :  { %v644_v54 = vpack.c.bf16 %v983_v53, %v982_v44 }
 0x2ef   :  { %v625_v55 = vpop.f32.mrf.mxu0 }
 0x2f0   :  { %v643_v56 = vpack.c.bf16 %v625_v55, %v622_v45  ;;  %984 = vmatprep.subr.bf16.mxu1 %v644_v54 }
 0x2f1   :  { %985 = vmatpush3.bf16.msra.mxu1 %v644_v54 }
 0x2f2   :  { %986 = vmatprep.subr.bf16.mxu1 %v643_v56 }
 0x2f5   :  { %987 = vmatpush3.bf16.msra.mxu1 %v643_v56 }
 0x2f6   :  { %988 = vmatprep.subr.bf16.mxu1 %v642_v57 }
 0x2f9   :  { %989 = vmatpush3.bf16.msra.mxu1 %v642_v57 }
 0x2fa   :  { %990 = vmatprep.subr.bf16.mxu1 %v641_v58 }
 0x2fd   :  { %991 = vmatpush3.bf16.msra.mxu1 %v641_v58 }
 0x2fe   :  { %992 = vmatprep.subr.bf16.mxu1 %v640_v59 }
 0x301   :  { %993 = vmatpush3.bf16.msra.mxu1 %v640_v59 }
 0x302   :  { %994 = vmatprep.subr.bf16.mxu1 %v639_v60 }
 0x305   :  { %995 = vmatpush3.bf16.msra.mxu1 %v639_v60 }
 0x306   :  { %996 = vmatprep.subr.bf16.mxu1 %v638_v61 }
 0x309   :  { %997 = vmatpush3.bf16.msra.mxu1 %v638_v61 }
 0x30a   :  { %998 = vmatprep.subr.bf16.mxu1 %v637_v62 }
 0x30d   :  { %999 = vmatpush3.bf16.msra.mxu1 %v637_v62 }
 0x310   :  { %1001 = vmatmul.mubr.bf16.vlgmr.msra.gmra.mxu1 %v1182_v46 }
 0x311   :  { %1004 = vmatprep.mubr.bf16.mxu1 %v1184_v47 }
 0x318   :  { %1005 = vmatmul.mubr.bf16.gmra.mxu1 %v1188_v48 }
 0x319   :  { %1008 = vmatprep.mubr.bf16.mxu1 %v1190_v49 }
 0x320   :  { %1009 = vmatmul.mubr.bf16.gmra.mxu1 %v1194_v50 }
 0x321   :  { %1012 = vmatprep.mubr.bf16.mxu1 %v1196_v51 }
 0x328   :  { %1013 = vmatmul.mubr.bf16.gmra.mxu1 %v1200_v52 }
 0x3d0   :  { %v1002_v63 = vpop.f32.mrf.mxu1 }
 0x3d1   :  { %v744_v0 = vmax.f32 %v1002_v63, 0.0 }
 0x3d2   :  { %v679_v1 = vpop.f32.mrf.mxu1 }
 0x3d3   :  { %760 = vst [vmem:[#allocation8 + $0x10] sm:$0xff] %v744_v0  ;;  %v742_v2 = vmax.f32 %v679_v1, 0.0 }
 0x3d4   :  { %v1003_v3 = vpop.f32.mrf.mxu1 }
 0x3d5   :  { %758 = vst [vmem:[#allocation8] sm:$0xff] %v742_v2  ;;  %v745_v46 = vmax.f32 %v1003_v3, 0.0 }
 0x3d6   :  { %v682_v4 = vpop.f32.mrf.mxu1 }
 0x3d7   :  { %761 = vst [vmem:[#allocation8 + $0x18] sm:$0xff] %v745_v46  ;;  %v743_v47 = vmax.f32 %v682_v4, 0.0 }
 0x3d8   :  { %v1006_v48 = vpop.f32.mrf.mxu1 }
 0x3d9   :  { %759 = vst [vmem:[#allocation8 + $0x8] sm:$0xff] %v743_v47  ;;  %v748_v49 = vmax.f32 %v1006_v48, 0.0 }
 0x3da   :  { %v695_v5 = vpop.f32.mrf.mxu1 }
 0x3db   :  { %764 = vst [vmem:[#allocation8 + $0x30] sm:$0xff] %v748_v49  ;;  %v746_v50 = vmax.f32 %v695_v5, 0.0 }
 0x3dc   :  { %v1007_v51 = vpop.f32.mrf.mxu1 }
 0x3dd   :  { %762 = vst [vmem:[#allocation8 + $0x20] sm:$0xff] %v746_v50  ;;  %v749_v52 = vmax.f32 %v1007_v51, 0.0 }
 0x3de   :  { %v698_v6 = vpop.f32.mrf.mxu1 }
 0x3df   :  { %765 = vst [vmem:[#allocation8 + $0x38] sm:$0xff] %v749_v52  ;;  %v747_v7 = vmax.f32 %v698_v6, 0.0 }
 0x3e0   :  { %v1010_v8 = vpop.f32.mrf.mxu1 }
 0x3e1   :  { %763 = vst [vmem:[#allocation8 + $0x28] sm:$0xff] %v747_v7  ;;  %v752_v9 = vmax.f32 %v1010_v8, 0.0 }
 0x3e2   :  { %v711_v10 = vpop.f32.mrf.mxu1 }
 0x3e3   :  { %768 = vst [vmem:[#allocation8 + $0x50] sm:$0xff] %v752_v9  ;;  %v750_v11 = vmax.f32 %v711_v10, 0.0 }
 0x3e4   :  { %v1011_v12 = vpop.f32.mrf.mxu1 }
 0x3e5   :  { %766 = vst [vmem:[#allocation8 + $0x40] sm:$0xff] %v750_v11  ;;  %v753_v13 = vmax.f32 %v1011_v12, 0.0 }
 0x3e6   :  { %v714_v14 = vpop.f32.mrf.mxu1 }
 0x3e7   :  { %769 = vst [vmem:[#allocation8 + $0x58] sm:$0xff] %v753_v13  ;;  %v751_v15 = vmax.f32 %v714_v14, 0.0 }
 0x3e8   :  { %v1014_v16 = vpop.f32.mrf.mxu1 }
 0x3e9   :  { %767 = vst [vmem:[#allocation8 + $0x48] sm:$0xff] %v751_v15  ;;  %v756_v17 = vmax.f32 %v1014_v16, 0.0 }
 0x3ea   :  { %v727_v18 = vpop.f32.mrf.mxu1 }
 0x3eb   :  { %772 = vst [vmem:[#allocation8 + $0x70] sm:$0xff] %v756_v17  ;;  %v754_v19 = vmax.f32 %v727_v18, 0.0 }
 0x3ec   :  { %v1015_v20 = vpop.f32.mrf.mxu1 }
 0x3ed   :  { %770 = vst [vmem:[#allocation8 + $0x60] sm:$0xff] %v754_v19  ;;  %v757_v21 = vmax.f32 %v1015_v20, 0.0 }
 0x3ee   :  { %v730_v22 = vpop.f32.mrf.mxu1 }
 0x3ef   :  { %773 = vst [vmem:[#allocation8 + $0x78] sm:$0xff] %v757_v21  ;;  %v755_v23 = vmax.f32 %v730_v22, 0.0 }
 0x3f1   :  { %771 = vst [vmem:[#allocation8 + $0x68] sm:$0xff] %v755_v23 }
 0x3f2   :  { %1127 = shalt.err (!%p1124_p5)
}
 0x3f3   :  { %s1148_s29 = smov 128   ;;  %s1149_s30 = smov 8  }
 0x3f4   :  { %785 = dma.vmem_to_hbm [thread:$0]  %s780_s2, 2048, %s1217_s3, [#allocation4], %s1148_s29, %s1148_s29, %s1149_s30  }
 0x3f5   :  { %1140 = dma.done.wait [#allocation4], 2048  }
 0x3f6   :  { %1141 = vsyncadd [#allocation4], 4294965248 }
 0x3f7   :  { %789 = vsyncpa [#allocation3], 1 }
 0x3f8   :  { %790 = vsyncpa [#allocation6], 1 }
 0x3f9   :  { %791 = vsyncpa [#allocation4], 1 }

</bundles_post_ra>
